<compile_context>
chip_gen: v6e
topology: v6e:2x2x1
jax: 0.10.0
libtpu: 0.0.40
codegen_flags: <defaults>
</compile_context>

<pallas_src>
import functools

import jax
import jax.numpy as jnp
from jax.experimental import pallas as pl
from jax.experimental.pallas import tpu as pltpu


def _round_up(x: int, m: int) -> int:
    return (x + m - 1) // m * m


def _bottleneck_kernel(x_ref, w_ref, b_ref, *refs,
                       hid: int, hid_pad: int, use_noise: bool):
    """Grid = (batch_tiles, k_tiles). Accumulates x @ W_packed over K into a
    f32 VMEM scratch, then runs the bias + reparameterization epilogue on the
    last K step and stores mu / log_var / z as separate (tile_b, hid) outputs."""
    if use_noise:
        noise_ref, z_ref, mu_ref, lv_ref, acc_ref = refs
    else:
        mu_ref, lv_ref, acc_ref = refs

    k = pl.program_id(1)

    # Fused MXU matmul for both Linear layers (f32 accumulation).  Cast x to the
    # weight dtype so a bf16-packed weight (MXU-bound sizes) takes the native path.
    prod = jnp.dot(x_ref[...].astype(w_ref.dtype), w_ref[...],
                   preferred_element_type=jnp.float32)

    @pl.when(k == 0)
    def _():
        acc_ref[...] = prod

    @pl.when(k > 0)
    def _():
        acc_ref[...] += prod

    @pl.when(k == pl.num_programs(1) - 1)
    def _():
        y = acc_ref[...] + b_ref[...]                 # (tile_b, 2*hid_pad) f32
        mu = y[:, :hid]                               # static, lane-aligned halves
        log_var = y[:, hid_pad:hid_pad + hid]
        mu_ref[...] = mu.astype(mu_ref.dtype)
        lv_ref[...] = log_var.astype(lv_ref.dtype)
        if use_noise:
            std = jnp.exp(0.5 * log_var)              # EUP; f32 epilogue on all chips
            z_ref[...] = (noise_ref[...].astype(jnp.float32) * std + mu
                          ).astype(z_ref.dtype)
        # eval path: z == mu, so there is no third store (wrapper aliases z to mu).


def pack_bottleneck_params(w_mu, b_mu, w_lv, b_lv, dtype=jnp.float32):
    """Pack both Linear layers ONCE at init time (not per forward call).

    w_mu / w_lv must be the pre-transposed nn.Linear weights, i.e. shape
    (inp_sz, hidden_sz), so the kernel computes y = x @ W + b directly.
    Each half is padded to a 128-lane boundary so all in-kernel slice offsets
    are lane-aligned.  Pass dtype=jnp.bfloat16 for MXU-bound sizes (halves
    weight DMA / VMEM; the bias + exp epilogue stays f32).
    """
    inp_sz, hid = w_mu.shape
    assert w_lv.shape == (inp_sz, hid)
    hid_pad = _round_up(hid, 128)
    w_packed = jnp.zeros((inp_sz, 2 * hid_pad), dtype)
    w_packed = w_packed.at[:, :hid].set(w_mu.astype(dtype))
    w_packed = w_packed.at[:, hid_pad:hid_pad + hid].set(w_lv.astype(dtype))
    b_packed = jnp.zeros((1, 2 * hid_pad), jnp.float32)
    b_packed = b_packed.at[:, :hid].set(b_mu.reshape(1, hid).astype(jnp.float32))
    b_packed = b_packed.at[:, hid_pad:hid_pad + hid].set(
        b_lv.reshape(1, hid).astype(jnp.float32))
    return w_packed, b_packed, hid


def _pick_tile_k(inp_sz, n_pad, w_itemsize, weight_budget):
    """Weights stay fully resident when they fit the budget; otherwise stream
    K-tiles (a multiple of 128 dividing inp_sz) over a reduction grid axis."""
    if inp_sz * n_pad * w_itemsize <= weight_budget or inp_sz % 128 != 0:
        # TODO(synk): pad/stream the K axis when a huge inp_sz is not a multiple
        # of 128 (currently kept fully resident in that case).
        return inp_sz
    tk = max(128, (weight_budget // (2 * n_pad * w_itemsize)) // 128 * 128)
    tk = min(tk, inp_sz)
    while inp_sz % tk:
        tk -= 128
    return tk


def bottleneck_variational(x, w_packed, b_packed, hid, use_noise, noise=None):
    """x: (B, inp_sz).  w_packed/b_packed from pack_bottleneck_params().
    use_noise must be static (Python int/bool).  Returns (z, mu, log_var),
    each (B, hid) in x.dtype."""
    use_noise = bool(use_noise)                       # static specialization
    B, inp_sz = x.shape
    n_pad = w_packed.shape[1]
    hid_pad = n_pad // 2
    assert w_packed.shape[0] == inp_sz and hid <= hid_pad
    if use_noise:
        if noise is None:
            # TODO(synk): optional in-kernel PRNG noise (pltpu.prng_seed +
            # pltpu.stateful_normal) to drop this HBM stream entirely; kept as an
            # explicit input so results stay reproducible / testable.
            raise ValueError("use_noise=1 requires `noise` of shape (B, hid).")
        assert noise.shape == (B, hid)
    out_dtype = x.dtype

    # ---- VMEM budget (v5e: 16 MiB default scoped; v7x: 64 MiB physical) ------
    try:
        vmem_cap = pltpu.get_tpu_info().vmem_capacity_bytes
    except Exception:
        vmem_cap = 64 * 1024 * 1024                   # v7x is the smallest / TC
    vmem_budget = int(vmem_cap * 0.7)                 # headroom for compiler scratch

    w_item = w_packed.dtype.itemsize
    x_item = x.dtype.itemsize

    # ---- K tiling (reduction axis; weights resident when they fit) -----------
    tile_k = _pick_tile_k(inp_sz, n_pad, w_item, vmem_budget // 3)
    nk = inp_sz // tile_k
    w_block_bytes = tile_k * n_pad * w_item
    # Grid-invariant resident weights: single-buffer the large ones (halves VMEM).
    single_buffer_w = (nk == 1) and w_block_bytes >= (2 << 20)
    w_vmem_bytes = w_block_bytes * (1 if single_buffer_w else 2) + 2 * n_pad * 4

    # ---- batch tiling (megacore-aware, VMEM-aware) ----------------------------
    b8 = _round_up(B, 8)
    if B >= 16:
        # At least 2 batch tiles so both v7x TensorCores get work.
        tile_b = min(512, _round_up(pl.cdiv(b8, 2), 8))
    else:
        tile_b = b8
    n_out = 3 if use_noise else 2

    def _tile_bytes(tb):
        bts = 2 * tb * tile_k * x_item                         # x (double-buffered)
        bts += n_out * 2 * tb * hid * out_dtype.itemsize       # outputs
        if use_noise:
            bts += 2 * tb * hid * noise.dtype.itemsize         # noise
        bts += tb * n_pad * 4                                  # f32 accumulator scratch
        return bts

    # TODO(synk): N-tile the packed hidden axis for very large hid_pad instead of
    # only shrinking tile_b.
    while tile_b > 8 and w_vmem_bytes + _tile_bytes(tile_b) > vmem_budget:
        tile_b = max(8, (tile_b // 2) // 8 * 8)
    nb = pl.cdiv(B, tile_b)

    footprint = w_vmem_bytes + _tile_bytes(tile_b)
    vmem_limit = int(min(vmem_budget,
                         max(32 * 1024 * 1024, footprint * 3 // 2 + (2 << 20))))

    w_spec_kwargs = {"pipeline_mode": pl.Buffered(1)} if single_buffer_w else {}
    in_specs = [
        pl.BlockSpec((tile_b, tile_k), lambda i, k: (i, k)),               # x
        pl.BlockSpec((tile_k, n_pad), lambda i, k: (k, 0), **w_spec_kwargs),  # W packed
        pl.BlockSpec((1, n_pad), lambda i, k: (0, 0)),                     # bias
    ]
    operands = [x, w_packed, b_packed]
    if use_noise:
        in_specs.append(pl.BlockSpec((tile_b, hid), lambda i, k: (i, 0)))  # noise
        operands.append(noise)

    out_shape = [jax.ShapeDtypeStruct((B, hid), out_dtype)] * n_out
    out_specs = [pl.BlockSpec((tile_b, hid), lambda i, k: (i, 0))] * n_out

    kernel = functools.partial(_bottleneck_kernel, hid=hid, hid_pad=hid_pad,
                               use_noise=use_noise)

    out = pl.pallas_call(
        kernel,
        grid=(nb, nk),
        in_specs=in_specs,
        out_specs=out_specs,
        out_shape=out_shape,
        scratch_shapes=[pltpu.VMEM((tile_b, n_pad), jnp.float32)],
        compiler_params=pltpu.CompilerParams(
            dimension_semantics=("parallel", "arbitrary"),
            vmem_limit_bytes=vmem_limit,
        ),
    )(*operands)

    if use_noise:
        z, mu, log_var = out
    else:
        mu, log_var = out
        z = mu            # noise *= 0  =>  z == mu; skip the duplicate HBM write
    return z, mu, log_var


if __name__ == "__main__":

    def run_case(B, inp_sz, hidden_sz, key):
        k_x, k_wm, k_bm, k_wl, k_bl, k_noise = jax.random.split(key, 6)
        scale = 1.0 / jnp.sqrt(jnp.float32(inp_sz))
        x = jax.random.normal(k_x, (B, inp_sz), dtype=jnp.float32)
        # nn.Linear(inp_sz, hidden_sz) params, stored pre-transposed (inp, hid).
        w_mu = jax.random.uniform(k_wm, (inp_sz, hidden_sz), jnp.float32, -scale, scale)
        b_mu = jax.random.uniform(k_bm, (hidden_sz,), jnp.float32, -scale, scale)
        w_lv = jax.random.uniform(k_wl, (inp_sz, hidden_sz), jnp.float32, -scale, scale)
        b_lv = jax.random.uniform(k_bl, (hidden_sz,), jnp.float32, -scale, scale)
        # torch.randn equivalent, supplied externally so the check is reproducible.
        noise = jax.random.normal(k_noise, (B, hidden_sz), dtype=jnp.float32)

        # Pack once ("init time"), reuse for every forward call.
        w_packed, b_packed, hid = pack_bottleneck_params(w_mu, b_mu, w_lv, b_lv)

        # Training path (use_noise = 1): reparameterization inside the kernel.
        z, mu, log_var = bottleneck_variational(x, w_packed, b_packed, hid, 1,
                                                noise=noise)
        jax.block_until_ready((z, mu, log_var))

        hp = jax.lax.Precision.HIGHEST
        mu_ref = jnp.dot(x, w_mu, precision=hp) + b_mu
        lv_ref = jnp.dot(x, w_lv, precision=hp) + b_lv
        z_ref = noise * jnp.exp(0.5 * lv_ref) + mu_ref
        assert z.shape == (B, hidden_sz) and mu.shape == (B, hidden_sz)
        assert jnp.allclose(mu, mu_ref, atol=1e-4, rtol=1e-4)
        assert jnp.allclose(log_var, lv_ref, atol=1e-4, rtol=1e-4)
        assert jnp.allclose(z, z_ref, atol=1e-4, rtol=1e-4)

        # Eval path (use_noise = 0): no noise DMA, no exp, no z store (z == mu).
        z0, mu0, lv0 = bottleneck_variational(x, w_packed, b_packed, hid, 0)
        jax.block_until_ready((z0, mu0, lv0))
        assert jnp.array_equal(z0, mu0)
        assert jnp.allclose(mu0, mu_ref, atol=1e-4, rtol=1e-4)
        assert jnp.allclose(lv0, lv_ref, atol=1e-4, rtol=1e-4)

    keys = jax.random.split(jax.random.PRNGKey(0), 2)
    # Tiny config (hid < 128: masked output stores, single batch tile).
    run_case(B=8, inp_sz=32, hidden_sz=32, key=keys[0])
    # Lane-dense config (hid % 128 == 0) with 2 batch tiles (megacore path).
    run_case(B=48, inp_sz=256, hidden_sz=128, key=keys[1])

    print("KERNEL_OK")
</pallas_src>

<mosaic_0001>
module attributes {stable_mosaic.version = 11 : i64} {
  func.func @_bottleneck_kernel(%arg0: i32, %arg1: i32, %arg2: memref<8x32xf32, #tpu.memory_space<vmem>>, %arg3: memref<32x256xf32, #tpu.memory_space<vmem>>, %arg4: memref<1x256xf32, #tpu.memory_space<vmem>>, %arg5: memref<8x32xf32, #tpu.memory_space<vmem>>, %arg6: memref<8x32xf32, #tpu.memory_space<vmem>>, %arg7: memref<8x32xf32, #tpu.memory_space<vmem>>, %arg8: memref<8x32xf32, #tpu.memory_space<vmem>>, %arg9: memref<8x256xf32, #tpu.memory_space<vmem>>) attributes {dimension_semantics = [#tpu.dimension_semantics<parallel>, #tpu.dimension_semantics<arbitrary>], iteration_bounds = array<i64: 1, 1>, scalar_prefetch = 0 : i64, scratch_operands = 1 : i64, tpu.core_type = #tpu.core_type<tc>, window_params = [{transform_indices = @transform_0, window_bounds = array<i64: 8, 32>}, {transform_indices = @transform_1, window_bounds = array<i64: 32, 256>}, {pipeline_mode = #tpu.pipeline_mode<synchronous>, transform_indices = @transform_2, window_bounds = array<i64: 1, 256>}, {transform_indices = @transform_3, window_bounds = array<i64: 8, 32>}, {transform_indices = @transform_4, window_bounds = array<i64: 8, 32>}, {transform_indices = @transform_5, window_bounds = array<i64: 8, 32>}, {transform_indices = @transform_6, window_bounds = array<i64: 8, 32>}]} {
    %c0 = arith.constant 0 : index
    %c0_0 = arith.constant 0 : index
    %0 = vector.load %arg2[%c0, %c0_0] : memref<8x32xf32, #tpu.memory_space<vmem>>, vector<8x32xf32>
    %c0_1 = arith.constant 0 : index
    %c0_2 = arith.constant 0 : index
    %1 = vector.load %arg3[%c0_1, %c0_2] : memref<32x256xf32, #tpu.memory_space<vmem>>, vector<32x256xf32>
    %cst = arith.constant dense<0.000000e+00> : vector<8x256xf32>
    %2 = tpu.matmul %0, %1, %cst {dimension_numbers = #tpu.dot_dimension_numbers<[1], [0], [0], [1], [0, 0, 1, 1], [], []>} : vector<8x32xf32>, vector<32x256xf32>, vector<8x256xf32> -> vector<8x256xf32>
    %c0_i32 = arith.constant 0 : i32
    %3 = arith.cmpi eq, %arg1, %c0_i32 : i32
    %4 = arith.extui %3 : i1 to i32
    %c0_i32_3 = arith.constant 0 : i32
    %5 = arith.cmpi ne, %4, %c0_i32_3 : i32
    scf.if %5 {
      %c0_8 = arith.constant 0 : index
      %c0_9 = arith.constant 0 : index
      %12 = vector.load %arg9[%c0_8, %c0_9] : memref<8x256xf32, #tpu.memory_space<vmem>>, vector<8x256xf32>
      tpu.vector_store %arg9[%c0_8, %c0_9], %2 {strides = array<i32>} : memref<8x256xf32, #tpu.memory_space<vmem>>, vector<8x256xf32>,
    } else {
    }
    %c0_i32_4 = arith.constant 0 : i32
    %6 = arith.cmpi sgt, %arg1, %c0_i32_4 : i32
    %7 = arith.extui %6 : i1 to i32
    %c0_i32_5 = arith.constant 0 : i32
    %8 = arith.cmpi ne, %7, %c0_i32_5 : i32
    scf.if %8 {
      %c0_8 = arith.constant 0 : index
      %c0_9 = arith.constant 0 : index
      %12 = vector.load %arg9[%c0_8, %c0_9] : memref<8x256xf32, #tpu.memory_space<vmem>>, vector<8x256xf32>
      %13 = arith.addf %12, %2 : vector<8x256xf32>
      %c0_10 = arith.constant 0 : index
      %c0_11 = arith.constant 0 : index
      %14 = vector.load %arg9[%c0_10, %c0_11] : memref<8x256xf32, #tpu.memory_space<vmem>>, vector<8x256xf32>
      tpu.vector_store %arg9[%c0_10, %c0_11], %13 {strides = array<i32>} : memref<8x256xf32, #tpu.memory_space<vmem>>, vector<8x256xf32>,
    } else {
    }
    %c0_i32_6 = arith.constant 0 : i32
    %9 = arith.cmpi eq, %arg1, %c0_i32_6 : i32
    %10 = arith.extui %9 : i1 to i32
    %c0_i32_7 = arith.constant 0 : i32
    %11 = arith.cmpi ne, %10, %c0_i32_7 : i32
    scf.if %11 {
      %c0_8 = arith.constant 0 : index
      %c0_9 = arith.constant 0 : index
      %12 = vector.load %arg9[%c0_8, %c0_9] : memref<8x256xf32, #tpu.memory_space<vmem>>, vector<8x256xf32>
      %c0_10 = arith.constant 0 : index
      %c0_11 = arith.constant 0 : index
      %13 = vector.load %arg4[%c0_10, %c0_11] : memref<1x256xf32, #tpu.memory_space<vmem>>, vector<1x256xf32>
      %14 = vector.broadcast %13 : vector<1x256xf32> to vector<8x256xf32>
      %15 = arith.addf %12, %14 : vector<8x256xf32>
      %16 = vector.extract_strided_slice %15 {offsets = [0, 0], sizes = [8, 32], strides = [1, 1]} : vector<8x256xf32> to vector<8x32xf32>
      %17 = vector.extract_strided_slice %15 {offsets = [0, 128], sizes = [8, 32], strides = [1, 1]} : vector<8x256xf32> to vector<8x32xf32>
      %c0_12 = arith.constant 0 : index
      %c0_13 = arith.constant 0 : index
      %18 = vector.load %arg7[%c0_12, %c0_13] : memref<8x32xf32, #tpu.memory_space<vmem>>, vector<8x32xf32>
      tpu.vector_store %arg7[%c0_12, %c0_13], %16 {strides = array<i32>} : memref<8x32xf32, #tpu.memory_space<vmem>>, vector<8x32xf32>,
      %c0_14 = arith.constant 0 : index
      %c0_15 = arith.constant 0 : index
      %19 = vector.load %arg8[%c0_14, %c0_15] : memref<8x32xf32, #tpu.memory_space<vmem>>, vector<8x32xf32>
      tpu.vector_store %arg8[%c0_14, %c0_15], %17 {strides = array<i32>} : memref<8x32xf32, #tpu.memory_space<vmem>>, vector<8x32xf32>,
      %cst_16 = arith.constant 5.000000e-01 : f32
      %20 = vector.broadcast %cst_16 : f32 to vector<8x32xf32>
      %21 = arith.mulf %20, %17 : vector<8x32xf32>
      %22 = math.exp %21 : vector<8x32xf32>
      %c0_17 = arith.constant 0 : index
      %c0_18 = arith.constant 0 : index
      %23 = vector.load %arg5[%c0_17, %c0_18] : memref<8x32xf32, #tpu.memory_space<vmem>>, vector<8x32xf32>
      %24 = arith.mulf %23, %22 : vector<8x32xf32>
      %25 = arith.addf %24, %16 : vector<8x32xf32>
      %c0_19 = arith.constant 0 : index
      %c0_20 = arith.constant 0 : index
      %26 = vector.load %arg6[%c0_19, %c0_20] : memref<8x32xf32, #tpu.memory_space<vmem>>, vector<8x32xf32>
      tpu.vector_store %arg6[%c0_19, %c0_20], %25 {strides = array<i32>} : memref<8x32xf32, #tpu.memory_space<vmem>>, vector<8x32xf32>,
    } else {
    }
    return
  }
  func.func @transform_0(%arg0: i32, %arg1: i32) -> (i32, i32) {
    %c0_i32 = arith.constant 0 : i32
    return %arg0, %arg1 : i32, i32
  }
  func.func @transform_1(%arg0: i32, %arg1: i32) -> (i32, i32) {
    %c0_i32 = arith.constant 0 : i32
    %c0_i32_0 = arith.constant 0 : i32
    return %arg1, %c0_i32 : i32, i32
  }
  func.func @transform_2(%arg0: i32, %arg1: i32) -> (i32, i32) {
    %c0_i32 = arith.constant 0 : i32
    %c0_i32_0 = arith.constant 0 : i32
    %c0_i32_1 = arith.constant 0 : i32
    return %c0_i32, %c0_i32_0 : i32, i32
  }
  func.func @transform_3(%arg0: i32, %arg1: i32) -> (i32, i32) {
    %c0_i32 = arith.constant 0 : i32
    %c0_i32_0 = arith.constant 0 : i32
    return %arg0, %c0_i32 : i32, i32
  }
  func.func @transform_4(%arg0: i32, %arg1: i32) -> (i32, i32) {
    %c0_i32 = arith.constant 0 : i32
    %c0_i32_0 = arith.constant 0 : i32
    return %arg0, %c0_i32 : i32, i32
  }
  func.func @transform_5(%arg0: i32, %arg1: i32) -> (i32, i32) {
    %c0_i32 = arith.constant 0 : i32
    %c0_i32_0 = arith.constant 0 : i32
    return %arg0, %c0_i32 : i32, i32
  }
  func.func @transform_6(%arg0: i32, %arg1: i32) -> (i32, i32) {
    %c0_i32 = arith.constant 0 : i32
    %c0_i32_0 = arith.constant 0 : i32
    return %arg0, %c0_i32 : i32, i32
  }
}

</mosaic_0001>

<bundles_post_ra>
// kernel: tpu_custom_call.1
= control target key start
LH: loop header
LB: loop body
LE: loop exit
PB: predicated region body
PF: predicated region fallthrough
CT: control target
= control target key end

     0   :  { %12 = vsyncpa [#allocation4], 0  ;;  %s439_s0 = inlined_call_operand.hbm [shape: f32[8,32], index: 0, kind: input, shape index: {}]   ;;  %s440_s1 = inlined_call_operand.hbm [shape: f32[32,256], index: 1, kind: input, shape index: {}]   ;;  %s441_s2 = inlined_call_operand.vmem [shape: f32[1,256], index: 2, kind: input, shape index: {}]   ;;  %s442_s3 = inlined_call_operand.hbm [shape: f32[8,32], index: 3, kind: input, shape index: {}]   ;;  %s443_s4 = inlined_call_operand.hbm [shape: f32[8,32], index: 4, kind: output, shape index: {0}]   ;;  %s444_s5 = inlined_call_operand.hbm [shape: f32[8,32], index: 5, kind: output, shape index: {1}]   ;;  %s445_s6 = inlined_call_operand.hbm [shape: f32[8,32], index: 6, kind: output, shape index: {2}]  }
   0x1   :  { %13 = vsyncpa [#allocation7], 0 }
   0x2   :  { %14 = vsyncpa [#allocation5], 0 }
   0x3   :  { %15 = vsyncpa [#allocation11], 0  ;;  %s370_s21 = smov [#allocation6]  }
   0x4   :  { %s31_s22 = sshll.u32 %s370_s21, 4  ;;  %s32_s22 = int_to_ptr.vmem [resolvable:$true] %s31_s22 }
   0x5   :  { %s250_s23 = scalar_lea.vmem %s32_s22, 1024  ;;  %p255_p1 = scmp.lt.s32.totalorder %s32_s22, %s32_s22 }
   0x6   :  { %p251_p0 = scmp.ne.s32.totalorder %s32_s22, %s250_s23  ;;  %p256_p2 = scmp.lt.s32.totalorder %s250_s23, %s250_s23 }
   0x8   :  { %p257_p3 = por %p256_p2, %p255_p1 }
   0xa   :  { %p258_p4 = pnand %p257_p3, %p251_p0 }
   0xc   :  { %261 = shalt.err (!%p258_p4)
}
   0xd   :  { %s371_s24 = smov 256   ;;  %s372_s25 = smov 16  }
   0xe   :  { %37 = dma.hbm_to_vmem [thread:$0]  %s440_s1, 1024, %s32_s22, [#allocation7], %s371_s24, %s371_s24, %s372_s25  }
   0xf   :  { %s373_s28 = smov [#allocation3]   ;;  %s374_s30 = smov [#allocation8]  }
  0x10   :  { %s22_s29 = sshll.u32 %s373_s28, 4  ;;  %s46_s7 = sshll.u32 %s374_s30, 4  ;;  %s23_s29 = int_to_ptr.vmem [resolvable:$true] %s22_s29  ;;  %s47_s7 = int_to_ptr.vmem [resolvable:$true] %s46_s7 }
  0x11   :  { %s270_s8 = scalar_lea.vmem %s23_s29, 128  ;;  %p275_p6 = scmp.lt.s32.totalorder %s23_s29, %s23_s29 }
  0x12   :  { %p271_p5 = scmp.ne.s32.totalorder %s23_s29, %s270_s8  ;;  %p276_p7 = scmp.lt.s32.totalorder %s270_s8, %s270_s8 }
  0x14   :  { %p277_p8 = por %p276_p7, %p275_p6 }
  0x16   :  { %p278_p9 = pnand %p277_p8, %p271_p5 }
  0x18   :  { %281 = shalt.err (!%p278_p9)
}
  0x19   :  { %25 = dma.hbm_to_vmem [thread:$0]  %s439_s0, 128, %s23_s29, [#allocation4]  }
  0x1a   :  { %s290_s11 = scalar_lea.vmem %s47_s7, 128  ;;  %p295_p11 = scmp.lt.s32.totalorder %s47_s7, %s47_s7 }
  0x1b   :  { %p291_p10 = scmp.ne.s32.totalorder %s47_s7, %s290_s11  ;;  %p296_p12 = scmp.lt.s32.totalorder %s290_s11, %s290_s11 }
  0x1d   :  { %p297_p13 = por %p296_p12, %p295_p11 }
  0x1f   :  { %p298_p0 = pnand %p297_p13, %p291_p10 }
  0x21   :  { %301 = shalt.err (!%p298_p0)
}
  0x22   :  { %49 = dma.hbm_to_vmem [thread:$0]  %s442_s3, 128, %s47_s7, [#allocation7]  }
  0x23   :  { %362 = dma.done.wait [#allocation4], 128  }
  0x24   :  { %363 = vsyncadd [#allocation4], 4294967168 }
  0x25   :  { %364 = dma.done.wait [#allocation7], 1152  }
  0x26   :  { %365 = vsyncadd [#allocation7], 4294966144  ;;  %v375_v0 = vmov 0.0   ;;  %v67_v1 = vld [vmem:[#allocation6 + $0x38] sm:$0xff]  ;;  %v66_v2 = vld [vmem:[#allocation6 + $0x30] sm:$0xff]  ;;  %vm68_vm0 = vcmask 261120   ;;  %v166_v10 = vlaneseq }
  0x27   :  { %136 = vmatprep.mubr.f32.mxu0 %v375_v0  ;;  %v65_v3 = vld [vmem:[#allocation6 + $0x28] sm:$0xff]  ;;  %96 = vmatprep.subr.mxu0 %v67_v1  ;;  %v64_v4 = vld [vmem:[#allocation6 + $0x20] sm:$0xff]  ;;  %v63_v5 = vld [vmem:[#allocation6 + $0x18] sm:$0xff]  ;;  %s376_s13 = smov [#allocation10]   ;;  %s377_s15 = smov [#allocation12]  }
  0x28   :  { %97 = vmatpush1.msra.mxu0 %v66_v2  ;;  %v62_v6 = vld [vmem:[#allocation6 + $0x10] sm:$0xff]  ;;  %v61_v7 = vld [vmem:[#allocation6 + $0x8] sm:$0xff]  ;;  %v60_v8 = vld [vmem:[#allocation6] sm:$0xff]  ;;  %v167_v11 = vshrl.u32 %v166_v10, 7  ;;  %s203_s14 = sshll.u32 %s376_s13, 4  ;;  %s213_s16 = sshll.u32 %s377_s15, 4  ;;  %s204_s14 = int_to_ptr.vmem [resolvable:$true] %s203_s14  ;;  %s214_s16 = int_to_ptr.vmem [resolvable:$true] %s213_s16 }
  0x29   :  { %98 = vmatprep.subr.mxu0 %v65_v3  ;;  %v59_v9 = vld [vmem:[#allocation3] sm:$0xff]  ;;  %s302_s17 = scalar_lea.vmem %s204_s14, 128  ;;  %p307_p2 = scmp.lt.s32.totalorder %s204_s14, %s204_s14 }
  0x2a   :  { %99 = vmatpush1.msra.mxu0 %v64_v4  ;;  %v168_v12 = vsub.s32 0, %v167_v11  ;;  %v164_v13 = vld [vmem:[%s441_s2] sm:$0x3]  ;;  %v172_v14 = vsub.s32 1, %v167_v11  ;;  %p303_p1 = scmp.ne.s32.totalorder %s204_s14, %s302_s17  ;;  %p308_p3 = scmp.lt.s32.totalorder %s302_s17, %s302_s17 }
  0x2b   :  { %100 = vmatprep.subr.mxu0 %v63_v5 }
  0x2c   :  { %101 = vmatpush1.msra.mxu0 %v62_v6  ;;  %v169_v15 = vrot.slane %v164_v13, %v168_v12  ;;  %v173_v16 = vrot.slane %v164_v13, %v172_v14  ;;  %p309_p4 = por %p308_p3, %p307_p2 }
  0x2d   :  { %102 = vmatprep.subr.mxu0 %v61_v7 }
  0x2e   :  { %103 = vmatpush1.msra.mxu0 %v60_v8  ;;  %p310_p5 = pnand %p309_p4, %p303_p1 }
  0x2f   :  { %230 = vmatmul.mubr.msk.f32.vlgmr.msra.gmra.mxu0 %vm68_vm0, %v59_v9 }
  0xef   :  { %v138_v17 = vpop.f32.mrf.mxu0 }
  0xf0   :  { %v176_v18 = vadd.f32 %v169_v15, %v138_v17 }
  0xf1   :  { %v140_v19 = vpop.f32.mrf.mxu0 }
  0xf2   :  { %178 = vst.msk [vmem:[#allocation10] sm:$0xff] %vm68_vm0, %v176_v18  ;;  %v177_v20 = vadd.f32 %v173_v16, %v140_v19 }
  0xf3   :  { %313 = shalt.err (!%p310_p5)
}
  0xf4   :  { %206 = dma.vmem_to_hbm [thread:$0]  %s204_s14, 128, %s444_s5, [#allocation11]   ;;  %v180_v21 = vmul.f32 0.5, %v177_v20  ;;  %179 = vst.msk [vmem:[#allocation12] sm:$0xff] %vm68_vm0, %v177_v20 }
  0xf5   :  { %s322_s19 = scalar_lea.vmem %s214_s16, 128  ;;  %p327_p7 = scmp.lt.s32.totalorder %s214_s16, %s214_s16 }
  0xf6   :  { %p323_p6 = scmp.ne.s32.totalorder %s214_s16, %s322_s19  ;;  %p328_p8 = scmp.lt.s32.totalorder %s322_s19, %s322_s19 }
  0xf8   :  { %p329_p9 = por %p328_p8, %p327_p7 }
  0xfa   :  { %p330_p10 = pnand %p329_p9, %p323_p6 }
  0xfc   :  { %333 = shalt.err (!%p330_p10)
}
  0xfd   :  { %216 = dma.vmem_to_hbm [thread:$0]  %s214_s16, 128, %s445_s6, [#allocation11]   ;;  %v181_v22 = vmul.f32 1.442695, %v180_v21  ;;  %v183_v23 = vld [vmem:[#allocation8] sm:$0xff] }
  0xfe   :  { %s378_s22 = smov [#allocation9]  }
  0xff   :  { %240 = vpow2.f32 %v181_v22  ;;  %s193_s5 = sshll.u32 %s378_s22, 4  ;;  %s194_s5 = int_to_ptr.vmem [resolvable:$true] %s193_s5 }
 0x100   :  { %s342_s23 = scalar_lea.vmem %s194_s5, 128  ;;  %p347_p12 = scmp.lt.s32.totalorder %s194_s5, %s194_s5 }
 0x101   :  { %p343_p11 = scmp.ne.s32.totalorder %s194_s5, %s342_s23  ;;  %p348_p13 = scmp.lt.s32.totalorder %s342_s23, %s342_s23 }
 0x103   :  { %p349_p0 = por %p348_p13, %p347_p12 }
 0x105   :  { %p350_p1 = pnand %p349_p0, %p343_p11 }
 0x10c   :  { %v241_v24 = vpop.eup %240 }
 0x10d   :  { %v184_v25 = vmul.f32 %v241_v24, %v183_v23 }
 0x10f   :  { %v185_v26 = vadd.f32 %v184_v25, %v176_v18 }
 0x111   :  { %186 = vst.msk [vmem:[#allocation9] sm:$0xff] %vm68_vm0, %v185_v26 }
 0x112   :  { %353 = shalt.err (!%p350_p1)
}
 0x113   :  { %196 = dma.vmem_to_hbm [thread:$0]  %s194_s5, 128, %s443_s4, [#allocation5]  }
 0x114   :  { %366 = dma.done.wait [#allocation5], 128  }
 0x115   :  { %367 = vsyncadd [#allocation5], 4294967168 }
 0x116   :  { %368 = dma.done.wait [#allocation11], 256  }
 0x117   :  { %369 = vsyncadd [#allocation11], 4294967040 }
 0x118   :  { %226 = vsyncpa [#allocation4], 1 }
 0x119   :  { %227 = vsyncpa [#allocation7], 1 }
 0x11a   :  { %228 = vsyncpa [#allocation5], 1 }
 0x11b   :  { %229 = vsyncpa [#allocation11], 1 }

</bundles_post_ra>
